<compile_context>
chip_gen: v5e
topology: v5e:2x2
jax: 0.10.0
libtpu: 0.0.40
codegen_flags: <defaults>
</compile_context>

<pallas_src>
import functools

import jax
import jax.numpy as jnp
from jax import lax
from jax.experimental import pallas as pl
from jax.experimental.pallas import tpu as pltpu


def _round_up(x: int, m: int) -> int:
    return ((x + m - 1) // m) * m


def _gaussian_tile_kernel(neg_inv_ref, sq_i_ref, sq_j_ref, xi_ref, xj_ref, k_ref):
    """Computes one (TM, TN) tile of K = exp(neg_inv * ||x_i - x_j||^2)."""
    xi = xi_ref[...]                                   # (TM, F) f32
    xj = xj_ref[...]                                   # (TN, F) f32
    # Cross term on the MXU; contract feature axis of both operands (no transpose).
    gram = lax.dot_general(
        xi, xj,
        dimension_numbers=(((1,), (1,)), ((), ())),
        preferred_element_type=jnp.float32,
    )                                                  # (TM, TN)
    d2 = sq_i_ref[...] + sq_j_ref[...] - 2.0 * gram    # |xi|^2 + |xj|^2 - 2<xi,xj>
    d2 = jnp.maximum(d2, 0.0)                          # clamp fp round-off
    # Single scalar reciprocal precomputed outside; only a VPU mul + EUP exp here.
    k_ref[...] = jnp.exp(d2 * neg_inv_ref[0, 0]).astype(k_ref.dtype)


def gaussian_kernel(x: jax.Array, alpha: float = 1.0, *, tile: int = 512):
    """Returns (K, sigma_square) matching GaussianKernel(track_running_stats=True).forward."""
    n, f = x.shape
    x = x.astype(jnp.float32)

    # --- Bandwidth (running stat) in closed form: sigma^2 = alpha * mean(D) ---
    sq = jnp.sum(x * x, axis=-1)                               # (N,)  row squared norms
    col_sum = jnp.sum(x, axis=0)                               # (F,)
    mean_d2 = 2.0 / n * jnp.sum(sq) - 2.0 / (n * n) * jnp.sum(col_sum * col_sum)
    sigma_sq = alpha * mean_d2
    # TODO(synk): if all rows are identical sigma_sq == 0 -> NaN (same as PyTorch).
    neg_inv = (-1.0 / (2.0 * sigma_sq)).reshape(1, 1).astype(jnp.float32)

    # --- Tiling: lane-aligned K tiles; pad N so the grid divides evenly ---
    t = min(tile, _round_up(n, 128))
    n_pad = _round_up(n, t)
    if n_pad != n:
        x_p = jnp.pad(x, ((0, n_pad - n), (0, 0)))
        sq_p = jnp.pad(sq, (0, n_pad - n))
    else:
        x_p, sq_p = x, sq
    sq_row = sq_p.reshape(n_pad, 1)
    sq_col = sq_p.reshape(1, n_pad)

    grid = (n_pad // t, n_pad // t)
    k_pad = pl.pallas_call(
        _gaussian_tile_kernel,
        out_shape=jax.ShapeDtypeStruct((n_pad, n_pad), jnp.float32),
        grid_spec=pltpu.PrefetchScalarGridSpec(
            num_scalar_prefetch=0,
            grid=grid,
            in_specs=[
                # scalar -1/(2 sigma^2), resident in SMEM
                pl.BlockSpec((1, 1), lambda i, j: (0, 0),
                             memory_space=pltpu.MemorySpace.SMEM),
                # row norms for the row tile / col tile (precomputed, no XLU transpose)
                pl.BlockSpec((t, 1), lambda i, j: (i, 0)),
                pl.BlockSpec((1, t), lambda i, j: (0, j)),
                # row tile and column tile of X (same array passed twice)
                pl.BlockSpec((t, f), lambda i, j: (i, 0)),
                pl.BlockSpec((t, f), lambda i, j: (j, 0)),
            ],
            out_specs=pl.BlockSpec((t, t), lambda i, j: (i, j)),
        ),
        compiler_params=pltpu.CompilerParams(
            dimension_semantics=("parallel", "parallel"),
        ),
    )(neg_inv, sq_row, sq_col, x_p, x_p)

    k = k_pad[:n, :n]
    return k, sigma_sq


def _reference(x: jax.Array, alpha: float = 1.0):
    # Pure-JAX reference mirroring the PyTorch code exactly (broadcast-subtract form).
    d2 = jnp.sum((x[None, :, :] - x[:, None, :]) ** 2, axis=2)
    sigma_sq = alpha * jnp.mean(d2)
    return jnp.exp(-d2 / (2.0 * sigma_sq)), sigma_sq


if __name__ == "__main__":
    # Small deterministic input: minibatch N = 8, feature dim F = 32.
    key = jax.random.PRNGKey(0)
    x = jax.random.normal(key, (8, 32), dtype=jnp.float32)

    k_mat, sigma_sq = gaussian_kernel(x, alpha=1.0)
    jax.block_until_ready(k_mat)
    jax.block_until_ready(sigma_sq)

    k_ref, sig_ref = _reference(x, alpha=1.0)
    assert k_mat.shape == (8, 8)
    assert jnp.allclose(k_mat, k_ref, rtol=1e-4, atol=1e-4), "K mismatch"
    assert jnp.allclose(sigma_sq, sig_ref, rtol=1e-4, atol=1e-4), "sigma^2 mismatch"

    print("KERNEL_OK")
</pallas_src>

<mosaic_0001>
module attributes {stable_mosaic.version = 11 : i64} {
  func.func @_gaussian_tile_kernel(%arg0: i32, %arg1: i32, %arg2: memref<1x1xf32, #tpu.memory_space<smem>>, %arg3: memref<128x1xf32, #tpu.memory_space<vmem>>, %arg4: memref<1x128xf32, #tpu.memory_space<vmem>>, %arg5: memref<128x32xf32, #tpu.memory_space<vmem>>, %arg6: memref<128x32xf32, #tpu.memory_space<vmem>>, %arg7: memref<128x128xf32, #tpu.memory_space<vmem>>) attributes {dimension_semantics = [#tpu.dimension_semantics<parallel>, #tpu.dimension_semantics<parallel>], iteration_bounds = array<i64: 1, 1>, scalar_prefetch = 0 : i64, scratch_operands = 0 : i64, tpu.core_type = #tpu.core_type<tc>, window_params = [{transform_indices = @transform_0, window_bounds = array<i64: 1, 1>}, {transform_indices = @transform_1, window_bounds = array<i64: 128, 1>}, {transform_indices = @transform_2, window_bounds = array<i64: 1, 128>}, {transform_indices = @transform_3, window_bounds = array<i64: 128, 32>}, {transform_indices = @transform_4, window_bounds = array<i64: 128, 32>}, {transform_indices = @transform_5, window_bounds = array<i64: 128, 128>}]} {
    %c0 = arith.constant 0 : index
    %c0_0 = arith.constant 0 : index
    %0 = vector.load %arg5[%c0, %c0_0] : memref<128x32xf32, #tpu.memory_space<vmem>>, vector<128x32xf32>
    %c0_1 = arith.constant 0 : index
    %c0_2 = arith.constant 0 : index
    %1 = vector.load %arg6[%c0_1, %c0_2] : memref<128x32xf32, #tpu.memory_space<vmem>>, vector<128x32xf32>
    %cst = arith.constant dense<0.000000e+00> : vector<128x128xf32>
    %2 = tpu.matmul %0, %1, %cst {dimension_numbers = #tpu.dot_dimension_numbers<[1], [1], [0], [0], [0, 0, 1, 0], [], []>} : vector<128x32xf32>, vector<128x32xf32>, vector<128x128xf32> -> vector<128x128xf32>
    %c0_3 = arith.constant 0 : index
    %c0_4 = arith.constant 0 : index
    %3 = vector.load %arg3[%c0_3, %c0_4] : memref<128x1xf32, #tpu.memory_space<vmem>>, vector<128x1xf32>
    %c0_5 = arith.constant 0 : index
    %c0_6 = arith.constant 0 : index
    %4 = vector.load %arg4[%c0_5, %c0_6] : memref<1x128xf32, #tpu.memory_space<vmem>>, vector<1x128xf32>
    %5 = vector.broadcast %3 : vector<128x1xf32> to vector<128x128xf32>
    %6 = vector.broadcast %4 : vector<1x128xf32> to vector<128x128xf32>
    %7 = arith.addf %5, %6 : vector<128x128xf32>
    %cst_7 = arith.constant 2.000000e+00 : f32
    %8 = vector.broadcast %cst_7 : f32 to vector<128x128xf32>
    %9 = arith.mulf %8, %2 : vector<128x128xf32>
    %10 = arith.subf %7, %9 : vector<128x128xf32>
    %cst_8 = arith.constant 0.000000e+00 : f32
    %11 = vector.broadcast %cst_8 : f32 to vector<128x128xf32>
    %12 = arith.maximumf %10, %11 : vector<128x128xf32>
    %c0_9 = arith.constant 0 : index
    %c0_10 = arith.constant 0 : index
    %13 = memref.load %arg2[%c0_9, %c0_10] : memref<1x1xf32, #tpu.memory_space<smem>>
    %14 = vector.broadcast %13 : f32 to vector<128x128xf32>
    %15 = arith.mulf %12, %14 : vector<128x128xf32>
    %16 = math.exp %15 : vector<128x128xf32>
    %c0_11 = arith.constant 0 : index
    %c0_12 = arith.constant 0 : index
    %17 = vector.load %arg7[%c0_11, %c0_12] : memref<128x128xf32, #tpu.memory_space<vmem>>, vector<128x128xf32>
    tpu.vector_store %arg7[%c0_11, %c0_12], %16 {strides = array<i32>} : memref<128x128xf32, #tpu.memory_space<vmem>>, vector<128x128xf32>,
    return
  }
  func.func @transform_0(%arg0: i32, %arg1: i32) -> (i32, i32) {
    %c0_i32 = arith.constant 0 : i32
    %c0_i32_0 = arith.constant 0 : i32
    %c0_i32_1 = arith.constant 0 : i32
    return %c0_i32, %c0_i32_0 : i32, i32
  }
  func.func @transform_1(%arg0: i32, %arg1: i32) -> (i32, i32) {
    %c0_i32 = arith.constant 0 : i32
    %c0_i32_0 = arith.constant 0 : i32
    return %arg0, %c0_i32 : i32, i32
  }
  func.func @transform_2(%arg0: i32, %arg1: i32) -> (i32, i32) {
    %c0_i32 = arith.constant 0 : i32
    %c0_i32_0 = arith.constant 0 : i32
    return %c0_i32, %arg1 : i32, i32
  }
  func.func @transform_3(%arg0: i32, %arg1: i32) -> (i32, i32) {
    %c0_i32 = arith.constant 0 : i32
    %c0_i32_0 = arith.constant 0 : i32
    return %arg0, %c0_i32 : i32, i32
  }
  func.func @transform_4(%arg0: i32, %arg1: i32) -> (i32, i32) {
    %c0_i32 = arith.constant 0 : i32
    %c0_i32_0 = arith.constant 0 : i32
    return %arg1, %c0_i32 : i32, i32
  }
  func.func @transform_5(%arg0: i32, %arg1: i32) -> (i32, i32) {
    %c0_i32 = arith.constant 0 : i32
    return %arg0, %arg1 : i32, i32
  }
}

</mosaic_0001>

<bundles_post_ra>
// kernel: tpu_custom_call.1
= control target key start
LH: loop header
LB: loop body
LE: loop exit
PB: predicated region body
PF: predicated region fallthrough
CT: control target
= control target key end

     0   :  { %vm54_vm0 = vcmask 261120   ;;  %v610_v3 = vmov 0   ;;  %s925_s0 = inlined_call_operand.<no memory space> [shape: f32[1,1], index: 0, kind: input, shape index: {}]   ;;  %s926_s1 = inlined_call_operand.vmem [shape: f32[128,1], index: 1, kind: input, shape index: {}]   ;;  %s927_s2 = inlined_call_operand.vmem [shape: f32[1,128], index: 2, kind: input, shape index: {}]   ;;  %s928_s3 = inlined_call_operand.vmem [shape: f32[128,32], index: 3, kind: input, shape index: {}]   ;;  %s929_s4 = inlined_call_operand.vmem [shape: f32[128,32], index: 4, kind: input, shape index: {}]   ;;  %s930_s5 = inlined_call_operand.hbm [shape: f32[128,128], index: 5, kind: output, shape index: {}]  }
   0x1   :  { %v53_v0 = vld [vmem:[%s929_s4 + $0x78] sm:$0xff]  ;;  %v52_v1 = vld [vmem:[%s929_s4 + $0x70] sm:$0xff]  ;;  %v216_v2 = vld [vmem:[%s926_s1] sm:$0xff]  ;;  %548 = vset.pattern.permute.xlu0 %v610_v3  ;;  %549 = vset.pattern.permute.xlu1 %v610_v3 }
   0x2   :  { %464 = vmatpush.xpose.msk.msra.mxu0 %vm54_vm0, %v53_v0  ;;  %496 = vmatpush.xpose.msk.msra.mxu1 %vm54_vm0, %v53_v0 }
   0x3   :  { %497 = vmatpush.xpose.msk.msra.mxu2 %vm54_vm0, %v53_v0  ;;  %498 = vmatpush.xpose.msk.msra.mxu3 %vm54_vm0, %v53_v0 }
   0x4   :  { %235 = vperm.xlu0 %548, %v216_v2   ;;  %550 = vset.pattern.permute.xlu2 %v610_v3 }
   0x5   :  { %11 = vsyncpa [#allocation4], 0  ;;  %v51_v4 = vld [vmem:[%s929_s4 + $0x68] sm:$0xff]  ;;  %v218_v5 = vld [vmem:[%s926_s1 + $0x10] sm:$0xff]  ;;  %s452_s16 = sshll.u32 %s930_s5, 4  ;;  %s612_s17 = smov 128   ;;  %s453_s16 = int_to_ptr.hbm [resolvable:$true] %s452_s16 }
   0x6   :  { %465 = vmatpush.xpose.msk.msra.mxu0 %vm54_vm0, %v52_v1  ;;  %499 = vmatpush.xpose.msk.msra.mxu1 %vm54_vm0, %v52_v1  ;;  %v217_v6 = vld [vmem:[%s926_s1 + $0x8] sm:$0xff]  ;;  %v50_v7 = vld [vmem:[%s929_s4 + $0x60] sm:$0xff]  ;;  %v49_v8 = vld [vmem:[%s929_s4 + $0x58] sm:$0xff]  ;;  %s613_s18 = smov 8  }
   0x7   :  { %500 = vmatpush.xpose.msk.msra.mxu2 %vm54_vm0, %v52_v1  ;;  %501 = vmatpush.xpose.msk.msra.mxu3 %vm54_vm0, %v52_v1  ;;  %v219_v9 = vld [vmem:[%s926_s1 + $0x18] sm:$0xff]  ;;  %v222_v10 = vld [vmem:[%s926_s1 + $0x30] sm:$0xff]  ;;  %v47_v12 = vld [vmem:[%s929_s4 + $0x48] sm:$0xff] }
   0x8   :  { %245 = vperm.xlu1 %549, %v218_v5   ;;  %v48_v11 = vld [vmem:[%s929_s4 + $0x50] sm:$0xff]  ;;  %v223_v13 = vld [vmem:[%s926_s1 + $0x38] sm:$0xff]  ;;  %v225_v14 = vld [vmem:[%s926_s1 + $0x48] sm:$0xff]  ;;  %v884_v5 = vstv %s925_s0  ;;  %s611_s0 = smov [#allocation3]  }
   0x9   :  { %v46_v15 = vld [vmem:[%s929_s4 + $0x40] sm:$0xff]  ;;  %v45_v16 = vld [vmem:[%s929_s4 + $0x38] sm:$0xff]  ;;  %v226_v19 = vld [vmem:[%s926_s1 + $0x50] sm:$0xff] }
   0xa   :  { %466 = vmatpush.xpose.msk.msra.mxu0 %vm54_vm0, %v51_v4  ;;  %502 = vmatpush.xpose.msk.msra.mxu1 %vm54_vm0, %v51_v4  ;;  %v228_v17 = vld [vmem:[%s926_s1 + $0x60] sm:$0xff]  ;;  %v44_v20 = vld [vmem:[%s929_s4 + $0x30] sm:$0xff]  ;;  %v43_v21 = vld [vmem:[%s929_s4 + $0x28] sm:$0xff] }
   0xb   :  { %503 = vmatpush.xpose.msk.msra.mxu2 %vm54_vm0, %v51_v4  ;;  %504 = vmatpush.xpose.msk.msra.mxu3 %vm54_vm0, %v51_v4  ;;  %v220_v18 = vld [vmem:[%s926_s1 + $0x20] sm:$0xff]  ;;  %v231_v22 = vld [vmem:[%s926_s1 + $0x78] sm:$0xff]  ;;  %v221_v23 = vld [vmem:[%s926_s1 + $0x28] sm:$0xff] }
   0xc   :  { %240 = vperm.xlu0 %548, %v217_v6   ;;  %255 = vperm.xlu2 %550, %v220_v18   ;;  %v229_v24 = vld [vmem:[%s926_s1 + $0x68] sm:$0xff]  ;;  %v42_v25 = vld [vmem:[%s929_s4 + $0x20] sm:$0xff]  ;;  %v41_v26 = vld [vmem:[%s929_s4 + $0x18] sm:$0xff] }
   0xd   :  { %v224_v27 = vld [vmem:[%s926_s1 + $0x40] sm:$0xff]  ;;  %v40_v28 = vld [vmem:[%s929_s4 + $0x10] sm:$0xff]  ;;  %v39_v29 = vld [vmem:[%s929_s4 + $0x8] sm:$0xff] }
   0xe   :  { %467 = vmatpush.xpose.msk.msra.mxu0 %vm54_vm0, %v50_v7  ;;  %505 = vmatpush.xpose.msk.msra.mxu1 %vm54_vm0, %v50_v7  ;;  %v227_v30 = vld [vmem:[%s926_s1 + $0x58] sm:$0xff]  ;;  %v38_v31 = vld [vmem:[%s929_s4] sm:$0xff]  ;;  %v230_v36 = vld [vmem:[%s926_s1 + $0x70] sm:$0xff] }
   0xf   :  { %506 = vmatpush.xpose.msk.msra.mxu2 %vm54_vm0, %v50_v7  ;;  %507 = vmatpush.xpose.msk.msra.mxu3 %vm54_vm0, %v50_v7  ;;  %v22_v32 = vld [vmem:[%s928_s3] sm:$0xff]  ;;  %v23_v37 = vld [vmem:[%s928_s3 + $0x8] sm:$0xff]  ;;  %v24_v41 = vld [vmem:[%s928_s3 + $0x10] sm:$0xff] }
  0x10   :  { %250 = vperm.xlu1 %549, %v219_v9   ;;  %v26_v33 = vld [vmem:[%s928_s3 + $0x20] sm:$0xff]  ;;  %v27_v38 = vld [vmem:[%s928_s3 + $0x28] sm:$0xff]  ;;  %v28_v42 = vld [vmem:[%s928_s3 + $0x30] sm:$0xff] }
  0x11   :  { %v30_v34 = vld [vmem:[%s928_s3 + $0x40] sm:$0xff]  ;;  %v31_v39 = vld [vmem:[%s928_s3 + $0x48] sm:$0xff]  ;;  %v32_v43 = vld [vmem:[%s928_s3 + $0x50] sm:$0xff] }
  0x12   :  { %468 = vmatpush.xpose.msk.msra.mxu0 %vm54_vm0, %v49_v8  ;;  %508 = vmatpush.xpose.msk.msra.mxu1 %vm54_vm0, %v49_v8  ;;  %v34_v35 = vld [vmem:[%s928_s3 + $0x60] sm:$0xff]  ;;  %v35_v40 = vld [vmem:[%s928_s3 + $0x68] sm:$0xff]  ;;  %v36_v44 = vld [vmem:[%s928_s3 + $0x70] sm:$0xff] }
  0x13   :  { %509 = vmatpush.xpose.msk.msra.mxu2 %vm54_vm0, %v49_v8  ;;  %510 = vmatpush.xpose.msk.msra.mxu3 %vm54_vm0, %v49_v8  ;;  %v25_v45 = vld [vmem:[%s928_s3 + $0x18] sm:$0xff]  ;;  %v875_v58 = vld [vmem:[%s927_s2] ss:$0 sm:$0xff]  ;;  %s450_s2 = sshll.u32 %s611_s0, 4  ;;  %s451_s2 = int_to_ptr.vmem [resolvable:$true] %s450_s2 }
  0x14   :  { %265 = vperm.xlu0 %548, %v222_v10   ;;  %260 = vperm.xlu2 %550, %v221_v23   ;;  %v29_v46 = vld [vmem:[%s928_s3 + $0x38] sm:$0xff] }
  0x15   :  { %v33_v47 = vld [vmem:[%s928_s3 + $0x58] sm:$0xff] }
  0x16   :  { %469 = vmatpush.xpose.msk.msra.mxu0 %vm54_vm0, %v48_v11  ;;  %511 = vmatpush.xpose.msk.msra.mxu1 %vm54_vm0, %v48_v11  ;;  %v37_v48 = vld [vmem:[%s928_s3 + $0x78] sm:$0xff] }
  0x17   :  { %512 = vmatpush.xpose.msk.msra.mxu2 %vm54_vm0, %v48_v11  ;;  %513 = vmatpush.xpose.msk.msra.mxu3 %vm54_vm0, %v48_v11 }
  0x18   :  { %270 = vperm.xlu1 %549, %v223_v13  }
  0x1a   :  { %470 = vmatpush.xpose.msk.msra.mxu0 %vm54_vm0, %v47_v12  ;;  %514 = vmatpush.xpose.msk.msra.mxu1 %vm54_vm0, %v47_v12 }
  0x1b   :  { %515 = vmatpush.xpose.msk.msra.mxu2 %vm54_vm0, %v47_v12  ;;  %516 = vmatpush.xpose.msk.msra.mxu3 %vm54_vm0, %v47_v12 }
  0x1c   :  { %280 = vperm.xlu0 %548, %v225_v14   ;;  %275 = vperm.xlu2 %550, %v224_v27  }
  0x1e   :  { %471 = vmatpush.xpose.msk.msra.mxu0 %vm54_vm0, %v46_v15  ;;  %517 = vmatpush.xpose.msk.msra.mxu1 %vm54_vm0, %v46_v15 }
  0x1f   :  { %518 = vmatpush.xpose.msk.msra.mxu2 %vm54_vm0, %v46_v15  ;;  %519 = vmatpush.xpose.msk.msra.mxu3 %vm54_vm0, %v46_v15 }
  0x20   :  { %285 = vperm.xlu1 %549, %v226_v19  }
  0x22   :  { %472 = vmatpush.xpose.msk.msra.mxu0 %vm54_vm0, %v45_v16  ;;  %520 = vmatpush.xpose.msk.msra.mxu1 %vm54_vm0, %v45_v16 }
  0x23   :  { %521 = vmatpush.xpose.msk.msra.mxu2 %vm54_vm0, %v45_v16  ;;  %522 = vmatpush.xpose.msk.msra.mxu3 %vm54_vm0, %v45_v16 }
  0x24   :  { %295 = vperm.xlu0 %548, %v228_v17   ;;  %290 = vperm.xlu2 %550, %v227_v30  }
  0x26   :  { %473 = vmatpush.xpose.msk.msra.mxu0 %vm54_vm0, %v44_v20  ;;  %523 = vmatpush.xpose.msk.msra.mxu1 %vm54_vm0, %v44_v20 }
  0x27   :  { %524 = vmatpush.xpose.msk.msra.mxu2 %vm54_vm0, %v44_v20  ;;  %525 = vmatpush.xpose.msk.msra.mxu3 %vm54_vm0, %v44_v20 }
  0x28   :  { %300 = vperm.xlu1 %549, %v229_v24  }
  0x2a   :  { %474 = vmatpush.xpose.msk.msra.mxu0 %vm54_vm0, %v43_v21  ;;  %526 = vmatpush.xpose.msk.msra.mxu1 %vm54_vm0, %v43_v21 }
  0x2b   :  { %527 = vmatpush.xpose.msk.msra.mxu2 %vm54_vm0, %v43_v21  ;;  %528 = vmatpush.xpose.msk.msra.mxu3 %vm54_vm0, %v43_v21 }
  0x2c   :  { %310 = vperm.xlu0 %548, %v231_v22   ;;  %305 = vperm.xlu2 %550, %v230_v36  }
  0x2e   :  { %475 = vmatpush.xpose.msk.msra.mxu0 %vm54_vm0, %v42_v25  ;;  %529 = vmatpush.xpose.msk.msra.mxu1 %vm54_vm0, %v42_v25 }
  0x2f   :  { %530 = vmatpush.xpose.msk.msra.mxu2 %vm54_vm0, %v42_v25  ;;  %531 = vmatpush.xpose.msk.msra.mxu3 %vm54_vm0, %v42_v25 }
  0x32   :  { %476 = vmatpush.xpose.msk.msra.mxu0 %vm54_vm0, %v41_v26  ;;  %532 = vmatpush.xpose.msk.msra.mxu1 %vm54_vm0, %v41_v26 }
  0x33   :  { %533 = vmatpush.xpose.msk.msra.mxu2 %vm54_vm0, %v41_v26  ;;  %534 = vmatpush.xpose.msk.msra.mxu3 %vm54_vm0, %v41_v26 }
  0x36   :  { %477 = vmatpush.xpose.msk.msra.mxu0 %vm54_vm0, %v40_v28  ;;  %535 = vmatpush.xpose.msk.msra.mxu1 %vm54_vm0, %v40_v28 }
  0x37   :  { %536 = vmatpush.xpose.msk.msra.mxu2 %vm54_vm0, %v40_v28  ;;  %537 = vmatpush.xpose.msk.msra.mxu3 %vm54_vm0, %v40_v28 }
  0x3a   :  { %478 = vmatpush.xpose.msk.msra.mxu0 %vm54_vm0, %v39_v29  ;;  %538 = vmatpush.xpose.msk.msra.mxu1 %vm54_vm0, %v39_v29 }
  0x3b   :  { %539 = vmatpush.xpose.msk.msra.mxu2 %vm54_vm0, %v39_v29  ;;  %540 = vmatpush.xpose.msk.msra.mxu3 %vm54_vm0, %v39_v29 }
  0x3e   :  { %479 = vmatpush.xpose.msk.msra.mxu0 %vm54_vm0, %v38_v31  ;;  %541 = vmatpush.xpose.msk.msra.mxu1 %vm54_vm0, %v38_v31 }
  0x3f   :  { %542 = vmatpush.xpose.msk.msra.mxu2 %vm54_vm0, %v38_v31  ;;  %543 = vmatpush.xpose.msk.msra.mxu3 %vm54_vm0, %v38_v31 }
  0x41   :  { %480 = vmatmul.msk.f32.vlgmr.msra.gmra.mxu0 %vm54_vm0, %v22_v32  ;;  %484 = vmatmul.msk.f32.vlgmr.msra.gmra.mxu1 %vm54_vm0, %v26_v33 }
  0x42   :  { %488 = vmatmul.msk.f32.vlgmr.msra.gmra.mxu2 %vm54_vm0, %v30_v34  ;;  %492 = vmatmul.msk.f32.vlgmr.msra.gmra.mxu3 %vm54_vm0, %v34_v35 }
  0x49   :  { %481 = vmatmul.msk.f32.gmra.mxu0 %vm54_vm0, %v23_v37  ;;  %485 = vmatmul.msk.f32.gmra.mxu1 %vm54_vm0, %v27_v38 }
  0x4a   :  { %489 = vmatmul.msk.f32.gmra.mxu2 %vm54_vm0, %v31_v39  ;;  %493 = vmatmul.msk.f32.gmra.mxu3 %vm54_vm0, %v35_v40 }
  0x51   :  { %482 = vmatmul.msk.f32.gmra.mxu0 %vm54_vm0, %v24_v41  ;;  %486 = vmatmul.msk.f32.gmra.mxu1 %vm54_vm0, %v28_v42 }
  0x52   :  { %490 = vmatmul.msk.f32.gmra.mxu2 %vm54_vm0, %v32_v43  ;;  %494 = vmatmul.msk.f32.gmra.mxu3 %vm54_vm0, %v36_v44 }
  0x59   :  { %483 = vmatmul.msk.f32.gmra.mxu0 %vm54_vm0, %v25_v45  ;;  %487 = vmatmul.msk.f32.gmra.mxu1 %vm54_vm0, %v29_v46 }
  0x5a   :  { %491 = vmatmul.msk.f32.gmra.mxu2 %vm54_vm0, %v33_v47  ;;  %495 = vmatmul.msk.f32.gmra.mxu3 %vm54_vm0, %v37_v48 }
  0x66   :  { %v256_v52 = vpop.permute.xlu2 %255 }
  0x67   :  { %v320_v63 = vadd.f32 %v875_v58, %v256_v52 }
  0x6e   :  { %v261_v55 = vpop.permute.xlu2 %260 }
  0x6f   :  { %v321_v10 = vadd.f32 %v875_v58, %v261_v55 }
  0x76   :  { %v236_v49 = vpop.permute.xlu0 %235  ;;  %v276_v59 = vpop.permute.xlu2 %275 }
  0x77   :  { %v316_v62 = vadd.f32 %v875_v58, %v236_v49  ;;  %v324_v15 = vadd.f32 %v875_v58, %v276_v59 }
  0x7a   :  { %v246_v50 = vpop.permute.xlu1 %245 }
  0x7b   :  { %v318_v35 = vadd.f32 %v875_v58, %v246_v50 }
  0x7e   :  { %v241_v51 = vpop.permute.xlu0 %240  ;;  %v892_v25 = vpop.permute.xlu2 %290 }
  0x7f   :  { %v317_v9 = vadd.f32 %v875_v58, %v241_v51 }
  0x82   :  { %v868_v53 = vpop.permute.xlu1 %250 }
  0x86   :  { %v266_v54 = vpop.permute.xlu0 %265 }
  0x87   :  { %v322_v36 = vadd.f32 %v875_v58, %v266_v54 }
  0x8a   :  { %v870_v56 = vpop.permute.xlu1 %270 }
  0x8e   :  { %v281_v57 = vpop.permute.xlu0 %280 }
  0x8f   :  { %v325_v39 = vadd.f32 %v875_v58, %v281_v57 }
  0x92   :  { %v879_v2 = vpop.permute.xlu1 %285 }
  0x96   :  { %v296_v8 = vpop.permute.xlu0 %295 }
  0x97   :  { %v328_v16 = vadd.f32 %v875_v58, %v296_v8 }
  0x9a   :  { %v301_v30 = vpop.permute.xlu1 %300 }
  0x9b   :  { %v329_v40 = vadd.f32 %v875_v58, %v301_v30 }
  0xbe   :  { %v168_v60 = vpop.f32.mrf.mxu0  ;;  %v180_v61 = vpop.f32.mrf.mxu1 }
  0xbf   :  { %v332_v0 = vmul.f32 2.0, %v168_v60  ;;  %v336_v1 = vmul.f32 2.0, %v180_v61 }
  0xc1   :  { %v348_v3 = vsub.f32 %v316_v62, %v332_v0  ;;  %v352_v4 = vsub.f32 %v320_v63, %v336_v1  ;;  %v306_v0 = vpop.permute.xlu2 %305 }
  0xc3   :  { %v364_v6 = vmax.f32 %v348_v3, 0.0  ;;  %v368_v7 = vmax.f32 %v352_v4, 0.0 }
  0xc5   :  { %v382_v11 = vmul.f32 %v884_v5, %v364_v6  ;;  %v386_v12 = vmul.f32 %v884_v5, %v368_v7  ;;  %v192_v13 = vpop.f32.mrf.mxu2  ;;  %v204_v14 = vpop.f32.mrf.mxu3  ;;  %v319_v7 = vadd.f32 %v875_v58, %v868_v53 }
  0xc6   :  { %v340_v17 = vmul.f32 2.0, %v192_v13  ;;  %v344_v18 = vmul.f32 2.0, %v204_v14  ;;  %v171_v19 = vpop.f32.mrf.mxu0  ;;  %v183_v20 = vpop.f32.mrf.mxu1 }
  0xc7   :  { %v398_v21 = vmul.f32 1.442695, %v382_v11  ;;  %v406_v22 = vmul.f32 1.442695, %v386_v12  ;;  %v333_v23 = vmul.f32 2.0, %v171_v19  ;;  %v337_v24 = vmul.f32 2.0, %v183_v20 }
  0xc8   :  { %v356_v26 = vsub.f32 %v324_v15, %v340_v17  ;;  %v360_v27 = vsub.f32 %v328_v16, %v344_v18  ;;  %v330_v11 = vadd.f32 %v875_v58, %v306_v0 }
  0xc9   :  { %552 = vpow2.f32 %v398_v21  ;;  %v349_v28 = vsub.f32 %v317_v9, %v333_v23  ;;  %v353_v29 = vsub.f32 %v321_v10, %v337_v24  ;;  %v326_v10 = vadd.f32 %v875_v58, %v879_v2 }
  0xca   :  { %554 = vpow2.f32 %v406_v22  ;;  %v372_v31 = vmax.f32 %v356_v26, 0.0  ;;  %v376_v32 = vmax.f32 %v360_v27, 0.0  ;;  %v323_v23 = vadd.f32 %v875_v58, %v870_v56 }
  0xcb   :  { %v365_v33 = vmax.f32 %v349_v28, 0.0  ;;  %v369_v34 = vmax.f32 %v353_v29, 0.0 }
  0xcc   :  { %v390_v37 = vmul.f32 %v884_v5, %v372_v31  ;;  %v394_v38 = vmul.f32 %v884_v5, %v376_v32 }
  0xcd   :  { %v383_v41 = vmul.f32 %v884_v5, %v365_v33  ;;  %v387_v42 = vmul.f32 %v884_v5, %v369_v34  ;;  %v195_v43 = vpop.f32.mrf.mxu2  ;;  %v207_v44 = vpop.f32.mrf.mxu3 }
  0xce   :  { %v414_v45 = vmul.f32 1.442695, %v390_v37  ;;  %v422_v46 = vmul.f32 1.442695, %v394_v38  ;;  %v341_v47 = vmul.f32 2.0, %v195_v43  ;;  %v345_v48 = vmul.f32 2.0, %v207_v44  ;;  %v174_v49 = vpop.f32.mrf.mxu0  ;;  %v186_v50 = vpop.f32.mrf.mxu1 }
  0xcf   :  { %v553_v51 = vpop.eup %552  ;;  %v400_v52 = vmul.f32 1.442695, %v383_v41  ;;  %v408_v54 = vmul.f32 1.442695, %v387_v42  ;;  %v334_v55 = vmul.f32 2.0, %v174_v49  ;;  %v338_v59 = vmul.f32 2.0, %v186_v50 }
  0xd0   :  { %v555_v57 = vpop.eup %554  ;;  %430 = vst [vmem:[#allocation3] sm:$0xff] %v553_v51  ;;  %556 = vpow2.f32 %v414_v45  ;;  %v357_v60 = vsub.f32 %v325_v39, %v341_v47  ;;  %v361_v61 = vsub.f32 %v329_v40, %v345_v48  ;;  %v327_v40 = vadd.f32 %v875_v58, %v892_v25 }
  0xd1   :  { %434 = vst [vmem:[#allocation3 + $0x20] sm:$0xff] %v555_v57  ;;  %558 = vpow2.f32 %v422_v46  ;;  %v350_v62 = vsub.f32 %v318_v35, %v334_v55  ;;  %v354_v63 = vsub.f32 %v322_v36, %v338_v59  ;;  %v311_v36 = vpop.permute.xlu0 %310 }
  0xd2   :  { %560 = vpow2.f32 %v400_v52  ;;  %v373_v1 = vmax.f32 %v357_v60, 0.0  ;;  %v377_v3 = vmax.f32 %v361_v61, 0.0  ;;  %v331_v50 = vadd.f32 %v875_v58, %v311_v36 }
  0xd3   :  { %562 = vpow2.f32 %v408_v54  ;;  %v366_v4 = vmax.f32 %v350_v62, 0.0  ;;  %v370_v6 = vmax.f32 %v354_v63, 0.0 }
  0xd4   :  { %v391_v8 = vmul.f32 %v884_v5, %v373_v1  ;;  %v395_v9 = vmul.f32 %v884_v5, %v377_v3 }
  0xd5   :  { %v384_v12 = vmul.f32 %v884_v5, %v366_v4  ;;  %v388_v13 = vmul.f32 %v884_v5, %v370_v6  ;;  %v198_v14 = vpop.f32.mrf.mxu2  ;;  %v210_v15 = vpop.f32.mrf.mxu3 }
  0xd6   :  { %v557_v16 = vpop.eup %556  ;;  %v416_v17 = vmul.f32 1.442695, %v391_v8  ;;  %v424_v18 = vmul.f32 1.442695, %v395_v9  ;;  %v342_v19 = vmul.f32 2.0, %v198_v14  ;;  %v346_v53 = vmul.f32 2.0, %v210_v15  ;;  %v177_v20 = vpop.f32.mrf.mxu0 }
  0xd7   :  { %v189_v21 = vpop.f32.mrf.mxu1  ;;  %v559_v22 = vpop.eup %558  ;;  %438 = vst [vmem:[#allocation3 + $0x40] sm:$0xff] %v557_v16  ;;  %v402_v2 = vmul.f32 1.442695, %v384_v12  ;;  %v410_v24 = vmul.f32 1.442695, %v388_v13  ;;  %v335_v26 = vmul.f32 2.0, %v177_v20 }
  0xd8   :  { %v561_v27 = vpop.eup %560  ;;  %442 = vst [vmem:[#allocation3 + $0x60] sm:$0xff] %v559_v22  ;;  %564 = vpow2.f32 %v416_v17  ;;  %v358_v28 = vsub.f32 %v326_v10, %v342_v19  ;;  %v362_v29 = vsub.f32 %v330_v11, %v346_v53  ;;  %v339_v30 = vmul.f32 2.0, %v189_v21 }
  0xd9   :  { %v563_v31 = vpop.eup %562  ;;  %431 = vst [vmem:[#allocation3 + $0x8] sm:$0xff] %v561_v27  ;;  %566 = vpow2.f32 %v424_v18  ;;  %v351_v32 = vsub.f32 %v319_v7, %v335_v26 }
  0xda   :  { %435 = vst [vmem:[#allocation3 + $0x28] sm:$0xff] %v563_v31  ;;  %568 = vpow2.f32 %v402_v2  ;;  %v374_v33 = vmax.f32 %v358_v28, 0.0  ;;  %v378_v34 = vmax.f32 %v362_v29, 0.0  ;;  %v355_v35 = vsub.f32 %v323_v23, %v339_v30 }
  0xdb   :  { %570 = vpow2.f32 %v410_v24  ;;  %v367_v56 = vmax.f32 %v351_v32, 0.0 }
  0xdc   :  { %v392_v37 = vmul.f32 %v884_v5, %v374_v33  ;;  %v396_v38 = vmul.f32 %v884_v5, %v378_v34  ;;  %v371_v39 = vmax.f32 %v355_v35, 0.0 }
  0xdd   :  { %v385_v41 = vmul.f32 %v884_v5, %v367_v56  ;;  %v201_v42 = vpop.f32.mrf.mxu2  ;;  %v213_v43 = vpop.f32.mrf.mxu3 }
  0xde   :  { %v565_v44 = vpop.eup %564  ;;  %v418_v45 = vmul.f32 1.442695, %v392_v37  ;;  %v426_v46 = vmul.f32 1.442695, %v396_v38  ;;  %v389_v47 = vmul.f32 %v884_v5, %v371_v39  ;;  %v343_v48 = vmul.f32 2.0, %v201_v42 }
  0xdf   :  { %v567_v49 = vpop.eup %566  ;;  %439 = vst [vmem:[#allocation3 + $0x48] sm:$0xff] %v565_v44  ;;  %v404_v51 = vmul.f32 1.442695, %v385_v41  ;;  %v347_v52 = vmul.f32 2.0, %v213_v43 }
  0xe0   :  { %v569_v54 = vpop.eup %568  ;;  %443 = vst [vmem:[#allocation3 + $0x68] sm:$0xff] %v567_v49  ;;  %572 = vpow2.f32 %v418_v45  ;;  %v412_v25 = vmul.f32 1.442695, %v389_v47  ;;  %v359_v55 = vsub.f32 %v327_v40, %v343_v48 }
  0xe1   :  { %v571_v59 = vpop.eup %570  ;;  %432 = vst [vmem:[#allocation3 + $0x10] sm:$0xff] %v569_v54  ;;  %574 = vpow2.f32 %v426_v46  ;;  %v363_v57 = vsub.f32 %v331_v50, %v347_v52 }
  0xe2   :  { %436 = vst [vmem:[#allocation3 + $0x30] sm:$0xff] %v571_v59  ;;  %576 = vpow2.f32 %v404_v51  ;;  %v375_v60 = vmax.f32 %v359_v55, 0.0 }
  0xe3   :  { %578 = vpow2.f32 %v412_v25  ;;  %v379_v61 = vmax.f32 %v363_v57, 0.0 }
  0xe4   :  { %v393_v62 = vmul.f32 %v884_v5, %v375_v60 }
  0xe5   :  { %v397_v58 = vmul.f32 %v884_v5, %v379_v61 }
  0xe6   :  { %v573_v63 = vpop.eup %572  ;;  %v420_v0 = vmul.f32 1.442695, %v393_v62 }
  0xe7   :  { %v575_v1 = vpop.eup %574  ;;  %440 = vst [vmem:[#allocation3 + $0x50] sm:$0xff] %v573_v63  ;;  %v428_v3 = vmul.f32 1.442695, %v397_v58 }
  0xe8   :  { %v577_v4 = vpop.eup %576  ;;  %444 = vst [vmem:[#allocation3 + $0x70] sm:$0xff] %v575_v1  ;;  %580 = vpow2.f32 %v420_v0 }
  0xe9   :  { %v579_v6 = vpop.eup %578  ;;  %433 = vst [vmem:[#allocation3 + $0x18] sm:$0xff] %v577_v4  ;;  %582 = vpow2.f32 %v428_v3 }
  0xea   :  { %437 = vst [vmem:[#allocation3 + $0x38] sm:$0xff] %v579_v6 }
  0xee   :  { %v581_v5 = vpop.eup %580 }
  0xef   :  { %v583_v7 = vpop.eup %582  ;;  %441 = vst [vmem:[#allocation3 + $0x58] sm:$0xff] %v581_v5 }
  0xf0   :  { %445 = vst [vmem:[#allocation3 + $0x78] sm:$0xff] %v583_v7 }
  0xf1   :  { %458 = dma.vmem_to_hbm [thread:$0]  %s451_s2, 2048, %s453_s16, [#allocation4], %s612_s17, %s612_s17, %s613_s18  }
  0xf2   :  { %608 = dma.done.wait [#allocation4], 2048  }
  0xf3   :  { %609 = vsyncadd [#allocation4], 4294965248 }
  0xf4   :  { %463 = vsyncpa [#allocation4], 1 }

</bundles_post_ra>
